<compile_context>
chip_gen: v6e
topology: v6e:2x2x1
jax: 0.10.0
libtpu: 0.0.40
codegen_flags: <defaults>
</compile_context>

<pallas_src>
import jax
import jax.numpy as jnp
from jax.experimental import pallas as pl
from jax.experimental.pallas import tpu as pltpu

HIDDEN = 512


def _round_up(x, m):
    return ((x + m - 1) // m) * m


def _activate_kernel(latent_ref, params_ref, out_ref):
    x = latent_ref[...]               # (rows, H)
    a = params_ref[0:1, :]            # (1, H) -> broadcasts over rows
    neg_b = params_ref[1:2, :]        # (1, H), b pre-negated in the wrapper
    m = params_ref[2:3, :]            # (1, H)

    d = x - m
    gt = x > m
    c = jnp.where(gt, a, neg_b)       # per-element exponent slope
    e = jnp.exp(c * d)                # single transcendental per element (EUP)
    sign = jnp.where(gt, 1.0, -1.0)
    out_ref[...] = sign * (e - 1.0)   # exp(a*d)-1   or   1-exp(-b*d)


def activate_ref(latent, a, b, mean):
    d = latent - mean
    return jnp.where(latent > mean, jnp.exp(a * d) - 1.0, -jnp.exp(-b * d) + 1.0)


def activate(latent, a, b, mean, *, block_rows=1024, min_pallas_batch=0):
    """latent: (B, 512) f32; a, b, mean: (1, 512) f32."""
    B, H = latent.shape
    assert H == HIDDEN
    assert latent.dtype == jnp.float32, "kernel tiling assumes f32 (8-row sublanes)"
    assert a.shape == (1, H) and b.shape == (1, H) and mean.shape == (1, H)

    if B < min_pallas_batch:
        # Tiny batch: let XLA fuse the elementwise chain with its neighbors.
        return activate_ref(latent, a, b, mean)

    # Stack the three (1, H) parameters into one (3, H) replicated block,
    # pre-negating b so the kernel needs only a select + one exp.
    params = jnp.concatenate([a, -b, mean], axis=0).astype(jnp.float32)

    # Tile rows: large (up to 2 MiB f32 tiles), multiple of 8 (sublane), but
    # capped so there are >= 2 grid steps when B > 8 (v7x two-TC sharding).
    rows = min(block_rows, _round_up(pl.cdiv(B, 2), 8))
    rows = max(rows, 8)
    grid = (pl.cdiv(B, rows),)        # ragged tail handled by Pallas masking

    cost = pl.CostEstimate(
        flops=8 * B * H,
        transcendentals=B * H,
        bytes_accessed=2 * B * H * 4 + 3 * H * 4,
    )

    return pl.pallas_call(
        _activate_kernel,
        out_shape=jax.ShapeDtypeStruct((B, H), latent.dtype),
        grid_spec=pltpu.PrefetchScalarGridSpec(
            num_scalar_prefetch=0,
            grid=grid,
            in_specs=[
                pl.BlockSpec((rows, H), lambda i: (i, 0)),   # latent tile
                pl.BlockSpec((3, H), lambda i: (0, 0)),      # [a; -b; mean]
            ],
            out_specs=pl.BlockSpec((rows, H), lambda i: (i, 0)),
        ),
        compiler_params=pltpu.CompilerParams(
            dimension_semantics=("parallel",)),
        input_output_aliases={0: 0},   # latent -> output (in-place when donated)
        cost_estimate=cost,
    )(latent, params)


if __name__ == "__main__":
    # Deterministic parameter init matching the PyTorch __init__:
    #   a = ones([1,512]), b = ones([1,512]), mean = zeros([1,512]) * -0.2 == zeros
    a = jnp.ones((1, HIDDEN), dtype=jnp.float32)
    b = jnp.ones((1, HIDDEN), dtype=jnp.float32)
    mean = jnp.zeros((1, HIDDEN), dtype=jnp.float32) * -0.2

    key = jax.random.PRNGKey(0)
    latent = jax.random.normal(key, (8, HIDDEN), dtype=jnp.float32)
    expected = activate_ref(latent, a, b, mean)

    out = jax.block_until_ready(activate(latent, a, b, mean))
    assert out.shape == latent.shape and out.dtype == latent.dtype
    assert jnp.allclose(out, expected, atol=1e-5, rtol=1e-5)

    # Ragged batch: 12 rows -> rows=8, grid=(2,), partial tail block, no pad/slice.
    latent2 = jax.random.normal(jax.random.PRNGKey(1), (12, HIDDEN), dtype=jnp.float32)
    out2 = jax.block_until_ready(activate(latent2, a, b, mean))
    assert out2.shape == latent2.shape
    assert jnp.allclose(out2, activate_ref(latent2, a, b, mean), atol=1e-5, rtol=1e-5)

    # Tiny-batch fallback path (pure-JAX, fused by XLA, no pallas_call).
    out3 = jax.block_until_ready(activate(latent, a, b, mean, min_pallas_batch=1024))
    assert jnp.allclose(out3, expected, atol=1e-5, rtol=1e-5)

    print("KERNEL_OK")
</pallas_src>

<mosaic_0001>
module attributes {stable_mosaic.version = 11 : i64} {
  func.func @_activate_kernel(%arg0: i32, %arg1: memref<8x512xf32, #tpu.memory_space<vmem>>, %arg2: memref<3x512xf32, #tpu.memory_space<vmem>>, %arg3: memref<8x512xf32, #tpu.memory_space<vmem>>) attributes {dimension_semantics = [#tpu.dimension_semantics<parallel>], iteration_bounds = array<i64: 1>, scalar_prefetch = 0 : i64, scratch_operands = 0 : i64, tpu.core_type = #tpu.core_type<tc>, window_params = [{transform_indices = @transform_0, window_bounds = array<i64: 8, 512>}, {pipeline_mode = #tpu.pipeline_mode<synchronous>, transform_indices = @transform_1, window_bounds = array<i64: 3, 512>}, {transform_indices = @transform_2, window_bounds = array<i64: 8, 512>}]} {
    %c0 = arith.constant 0 : index
    %c0_0 = arith.constant 0 : index
    %0 = vector.load %arg1[%c0, %c0_0] : memref<8x512xf32, #tpu.memory_space<vmem>>, vector<8x512xf32>
    %c0_1 = arith.constant 0 : index
    %c0_2 = arith.constant 0 : index
    %1 = vector.load %arg2[%c0_1, %c0_2] : memref<3x512xf32, #tpu.memory_space<vmem>>, vector<1x512xf32>
    %c1 = arith.constant 1 : index
    %c0_3 = arith.constant 0 : index
    %2 = vector.load %arg2[%c1, %c0_3] : memref<3x512xf32, #tpu.memory_space<vmem>>, vector<1x512xf32>
    %c2 = arith.constant 2 : index
    %c0_4 = arith.constant 0 : index
    %3 = vector.load %arg2[%c2, %c0_4] : memref<3x512xf32, #tpu.memory_space<vmem>>, vector<1x512xf32>
    %4 = vector.broadcast %3 : vector<1x512xf32> to vector<8x512xf32>
    %5 = arith.subf %0, %4 : vector<8x512xf32>
    %6 = vector.broadcast %3 : vector<1x512xf32> to vector<8x512xf32>
    %7 = arith.cmpf ogt, %0, %6 : vector<8x512xf32>
    %8 = vector.shape_cast %1 : vector<1x512xf32> to vector<1x512xf32>
    %9 = vector.broadcast %8 : vector<1x512xf32> to vector<8x512xf32>
    %10 = vector.shape_cast %2 : vector<1x512xf32> to vector<1x512xf32>
    %11 = vector.broadcast %10 : vector<1x512xf32> to vector<8x512xf32>
    %12 = arith.select %7, %9, %11 : vector<8x512xi1>, vector<8x512xf32>
    %13 = arith.mulf %12, %5 : vector<8x512xf32>
    %14 = math.exp %13 : vector<8x512xf32>
    %cst = arith.constant 1.000000e+00 : f32
    %cst_5 = arith.constant -1.000000e+00 : f32
    %15 = vector.broadcast %cst : f32 to vector<8x512xf32>
    %16 = vector.broadcast %cst_5 : f32 to vector<8x512xf32>
    %17 = arith.select %7, %15, %16 : vector<8x512xi1>, vector<8x512xf32>
    %cst_6 = arith.constant 1.000000e+00 : f32
    %18 = vector.broadcast %cst_6 : f32 to vector<8x512xf32>
    %19 = arith.subf %14, %18 : vector<8x512xf32>
    %20 = arith.mulf %17, %19 : vector<8x512xf32>
    %c0_7 = arith.constant 0 : index
    %c0_8 = arith.constant 0 : index
    %21 = vector.load %arg3[%c0_7, %c0_8] : memref<8x512xf32, #tpu.memory_space<vmem>>, vector<8x512xf32>
    tpu.vector_store %arg3[%c0_7, %c0_8], %20 {strides = array<i32>} : memref<8x512xf32, #tpu.memory_space<vmem>>, vector<8x512xf32>,
    return
  }
  func.func @transform_0(%arg0: i32) -> (i32, i32) {
    %c0_i32 = arith.constant 0 : i32
    %c0_i32_0 = arith.constant 0 : i32
    return %arg0, %c0_i32 : i32, i32
  }
  func.func @transform_1(%arg0: i32) -> (i32, i32) {
    %c0_i32 = arith.constant 0 : i32
    %c0_i32_0 = arith.constant 0 : i32
    %c0_i32_1 = arith.constant 0 : i32
    return %c0_i32, %c0_i32_0 : i32, i32
  }
  func.func @transform_2(%arg0: i32) -> (i32, i32) {
    %c0_i32 = arith.constant 0 : i32
    %c0_i32_0 = arith.constant 0 : i32
    return %arg0, %c0_i32 : i32, i32
  }
}

</mosaic_0001>

<bundles_post_ra>
// kernel: tpu_custom_call.1
= control target key start
LH: loop header
LB: loop body
LE: loop exit
PB: predicated region body
PF: predicated region fallthrough
CT: control target
= control target key end

     0   :  { %7 = vsyncpa [#allocation3], 0  ;;  %s253_s0 = inlined_call_operand.hbm [shape: f32[8,512], index: 0, kind: input, shape index: {}, may-alias: {0,2}]   ;;  %s254_s1 = inlined_call_operand.vmem [shape: f32[3,512], index: 1, kind: input, shape index: {}]   ;;  %s255_s2 = inlined_call_operand.hbm [shape: f32[8,512], index: 2, kind: output, shape index: {}, may-alias: {0,2}]  }
   0x1   :  { %8 = vsyncpa [#allocation4], 0  ;;  %s212_s9 = smov [#allocation2]  }
   0x2   :  { %s15_s10 = sshll.u32 %s212_s9, 4  ;;  %s16_s10 = int_to_ptr.vmem [resolvable:$true] %s15_s10 }
   0x3   :  { %s176_s11 = scalar_lea.vmem %s16_s10, 512  ;;  %p181_p1 = scmp.lt.s32.totalorder %s16_s10, %s16_s10 }
   0x4   :  { %p177_p0 = scmp.ne.s32.totalorder %s16_s10, %s176_s11  ;;  %p182_p2 = scmp.lt.s32.totalorder %s176_s11, %s176_s11 }
   0x6   :  { %p183_p3 = por %p182_p2, %p181_p1 }
   0x8   :  { %p184_p4 = pnand %p183_p3, %p177_p0 }
   0xa   :  { %187 = shalt.err (!%p184_p4)
}
   0xb   :  { %18 = dma.hbm_to_vmem [thread:$0]  %s253_s0, 512, %s16_s10, [#allocation3]  }
   0xc   :  { %208 = dma.done.wait [#allocation3], 512  }
   0xd   :  { %209 = vsyncadd [#allocation3], 4294966784  ;;  %v34_v0 = vlaneseq  ;;  %v24_v6 = vld [vmem:[#allocation2] sm:$0xff]  ;;  %v25_v8 = vld [vmem:[#allocation2 + $0x8] sm:$0xff]  ;;  %v213_v42 = vmov -1.0  }
   0xe   :  { %v28_v7 = vld [vmem:[%s254_s1] ss:$4 sm:$0xf]  ;;  %v151_v9 = vld [vmem:[%s254_s1 + $0x1] ss:$4 sm:$0xf] }
   0xf   :  { %v35_v1 = vshrl.u32 %v34_v0, 7  ;;  %v152_v10 = vld [vmem:[%s254_s1 + $0x2] ss:$4 sm:$0xf]  ;;  %v26_v19 = vld [vmem:[#allocation2 + $0x10] sm:$0xff]  ;;  %v27_v26 = vld [vmem:[#allocation2 + $0x18] sm:$0xff] }
  0x10   :  { %s214_s1 = smov [#allocation5]  }
  0x11   :  { %v36_v2 = vsub.s32 0, %v35_v1  ;;  %v40_v3 = vsub.s32 1, %v35_v1  ;;  %v44_v4 = vsub.s32 2, %v35_v1  ;;  %v48_v5 = vsub.s32 3, %v35_v1  ;;  %s142_s19 = sshll.u32 %s214_s1, 4  ;;  %s143_s19 = int_to_ptr.vmem [resolvable:$true] %s142_s19 }
  0x12   :  { %s188_s20 = scalar_lea.vmem %s143_s19, 512  ;;  %p193_p6 = scmp.lt.s32.totalorder %s143_s19, %s143_s19 }
  0x13   :  { %v66_v11 = vrot.slane %v28_v7, %v36_v2  ;;  %v70_v12 = vrot.slane %v28_v7, %v40_v3  ;;  %v74_v13 = vrot.slane %v28_v7, %v44_v4  ;;  %v78_v14 = vrot.slane %v28_v7, %v48_v5  ;;  %p189_p5 = scmp.ne.s32.totalorder %s143_s19, %s188_s20  ;;  %p194_p7 = scmp.lt.s32.totalorder %s188_s20, %s188_s20 }
  0x14   :  { %v37_v15 = vrot.slane %v152_v10, %v36_v2  ;;  %v87_v16 = vrot.slane %v151_v9, %v36_v2  ;;  %v41_v17 = vrot.slane %v152_v10, %v40_v3  ;;  %v91_v18 = vrot.slane %v151_v9, %v40_v3 }
  0x15   :  { %v45_v20 = vrot.slane %v152_v10, %v44_v4  ;;  %v95_v21 = vrot.slane %v151_v9, %v44_v4  ;;  %v49_v22 = vrot.slane %v152_v10, %v48_v5  ;;  %v99_v23 = vrot.slane %v151_v9, %v48_v5  ;;  %p195_p8 = por %p194_p7, %p193_p6 }
  0x16   :  { %v54_v24 = vsub.f32 %v24_v6, %v37_v15  ;;  %vm58_vm0 = vcmp.gt.f32.partialorder %v24_v6, %v37_v15  ;;  %v55_v25 = vsub.f32 %v25_v8, %v41_v17  ;;  %vm59_vm1 = vcmp.gt.f32.partialorder %v25_v8, %v41_v17 }
  0x17   :  { %v104_v27 = vsel %vm58_vm0, %v66_v11, %v87_v16  ;;  %v105_v28 = vsel %vm59_vm1, %v70_v12, %v91_v18  ;;  %v56_v31 = vsub.f32 %v26_v19, %v45_v20  ;;  %vm60_vm2 = vcmp.gt.f32.partialorder %v26_v19, %v45_v20  ;;  %p196_p9 = pnand %p195_p8, %p189_p5 }
  0x18   :  { %v108_v29 = vmul.f32 %v104_v27, %v54_v24  ;;  %v109_v30 = vmul.f32 %v105_v28, %v55_v25  ;;  %v106_v32 = vsel %vm60_vm2, %v74_v13, %v95_v21  ;;  %v57_v33 = vsub.f32 %v27_v26, %v49_v22 }
  0x19   :  { %vm61_vm3 = vcmp.gt.f32.partialorder %v27_v26, %v49_v22  ;;  %v110_v36 = vmul.f32 %v106_v32, %v56_v31  ;;  %v120_v43 = vsel %vm58_vm0, 1.0, %v213_v42  ;;  %v121_v46 = vsel %vm59_vm1, 1.0, %v213_v42 }
  0x1a   :  { %v112_v34 = vmul.f32 1.442695, %v108_v29  ;;  %v114_v35 = vmul.f32 1.442695, %v109_v30  ;;  %v107_v37 = vsel %vm61_vm3, %v78_v14, %v99_v23  ;;  %v122_v49 = vsel %vm60_vm2, 1.0, %v213_v42 }
  0x1b   :  { %v111_v38 = vmul.f32 %v107_v37, %v57_v33  ;;  %v116_v39 = vmul.f32 1.442695, %v110_v36  ;;  %v123_v53 = vsel %vm61_vm3, 1.0, %v213_v42 }
  0x1c   :  { %160 = vpow2.f32 %v112_v34 }
  0x1d   :  { %162 = vpow2.f32 %v114_v35  ;;  %v118_v40 = vmul.f32 1.442695, %v111_v38 }
  0x1e   :  { %164 = vpow2.f32 %v116_v39 }
  0x1f   :  { %166 = vpow2.f32 %v118_v40 }
  0x29   :  { %v161_v41 = vpop.eup %160 }
  0x2a   :  { %v163_v44 = vpop.eup %162  ;;  %v153_v45 = vadd.f32 -1.0, %v161_v41 }
  0x2b   :  { %v165_v47 = vpop.eup %164  ;;  %v154_v48 = vadd.f32 -1.0, %v163_v44 }
  0x2c   :  { %v167_v50 = vpop.eup %166  ;;  %v128_v51 = vmul.f32 %v153_v45, %v120_v43  ;;  %v155_v52 = vadd.f32 -1.0, %v165_v47 }
  0x2d   :  { %v129_v54 = vmul.f32 %v154_v48, %v121_v46  ;;  %v156_v55 = vadd.f32 -1.0, %v167_v50 }
  0x2e   :  { %132 = vst [vmem:[#allocation5] sm:$0xff] %v128_v51  ;;  %v130_v56 = vmul.f32 %v155_v52, %v122_v49 }
  0x2f   :  { %133 = vst [vmem:[#allocation5 + $0x8] sm:$0xff] %v129_v54  ;;  %v131_v57 = vmul.f32 %v156_v55, %v123_v53 }
  0x30   :  { %134 = vst [vmem:[#allocation5 + $0x10] sm:$0xff] %v130_v56 }
  0x31   :  { %135 = vst [vmem:[#allocation5 + $0x18] sm:$0xff] %v131_v57 }
  0x32   :  { %199 = shalt.err (!%p196_p9)
}
  0x33   :  { %145 = dma.vmem_to_hbm [thread:$0]  %s143_s19, 512, %s255_s2, [#allocation4]  }
  0x34   :  { %210 = dma.done.wait [#allocation4], 512  }
  0x35   :  { %211 = vsyncadd [#allocation4], 4294966784 }
  0x36   :  { %149 = vsyncpa [#allocation3], 1 }
  0x37   :  { %150 = vsyncpa [#allocation4], 1 }

</bundles_post_ra>
